<compile_context>
chip_gen: v5e
topology: v5e:2x2
jax: 0.10.0
libtpu: 0.0.40
codegen_flags: <defaults>
</compile_context>

<pallas_src>
import jax
import jax.numpy as jnp
import numpy as np
from jax.experimental import pallas as pl
from jax.experimental.pallas import tpu as pltpu


def _subpointconv_kernel(x_ref, w1_ref, b1_ref, w2_ref, b2_ref, o_ref):
    # x_ref : (C, tile_m)     channels on sublanes, fused group*point axis on lanes
    # w1_ref: (H, C)    b1_ref: (H, 1)     (biases f32)
    # w2_ref: (Cout, H) b2_ref: (Cout, 1)
    # o_ref : (Cout, tile_m)  lane-dense output block
    x = x_ref[...]
    h = jnp.dot(w1_ref[...], x, preferred_element_type=jnp.float32) + b1_ref[...]
    h = jnp.maximum(h, 0.0).astype(w2_ref.dtype)
    y = jnp.dot(w2_ref[...], h, preferred_element_type=jnp.float32) + b2_ref[...]
    o_ref[...] = y.astype(o_ref.dtype)


def _vmem_budgets():
    """(tile-data budget, vmem_limit_bytes) with headroom, safe on v5e/v6e/v7x."""
    vmem_cap = None
    try:
        info = pltpu.get_tpu_info()
        vmem_cap = getattr(info, "vmem_capacity_bytes", None)
    except Exception:
        vmem_cap = None
    if not vmem_cap or vmem_cap <= 0:
        vmem_cap = 64 * 1024 * 1024          # assume the smallest (v7x: 64 MiB/TC)
    vmem_limit = min(int(vmem_cap * 0.75), 96 * 1024 * 1024)
    budget = min(int(vmem_limit * 0.45), 32 * 1024 * 1024)
    return budget, vmem_limit


def _choose_tile_m(M, B, C, H, Cout, itemsize, budget, min_total_steps=4):
    """Lane-tile over the fused (group*point) axis M = G*N."""
    if M <= 256:
        return M                              # single full-extent block (legal, no pad)
    per_lane = (C * itemsize * 3              # input block (headroom for deeper buffering)
                + Cout * itemsize * 2         # output block (double-buffered)
                + H * 4 * 2)                  # f32 hidden intermediate (+ headroom)
    t_max = max(128, (budget // per_lane) // 128 * 128)
    t_max = min(t_max, 16384)                 # soft cap
    m_pad = pl.cdiv(M, 128) * 128
    t = min(t_max, m_pad)
    # Keep >= min_total_steps grid steps (>= 2 per v7x TensorCore) so input DMA /
    # output writeback overlap with compute; never shrink below the ~512-lane
    # HBM-roofline knee just for step count.
    if B * pl.cdiv(M, t) < min_total_steps and t > 512:
        target_tiles = pl.cdiv(min_total_steps, B)
        t_bal = pl.cdiv(pl.cdiv(M, target_tiles), 128) * 128
        t = max(512, min(t, t_bal))
    return t


def sub_point_conv(feats, w1, b1, w2, b2, group_num, compute_dtype=None):
    """feats: (B, C*G, N) -> (B, Cout, N, G), per-point grouped 2-layer MLP."""
    B, CG, N = feats.shape
    G = group_num
    C = CG // G
    assert CG == C * G, (CG, G)
    H = w1.shape[0]
    Cout = w2.shape[0]

    dtype = jnp.dtype(compute_dtype) if compute_dtype is not None else feats.dtype
    itemsize = jnp.dtype(dtype).itemsize

    # 'b (c g) n -> (b, c, g*n)' is a FREE view (channel index = c*G + g; g,n contiguous).
    M = G * N
    x = feats.reshape(B, C, M)
    if x.dtype != dtype:
        x = x.astype(dtype)

    budget, vmem_limit = _vmem_budgets()
    tile_m = _choose_tile_m(M, B, C, H, Cout, itemsize, budget)
    num_mt = pl.cdiv(M, tile_m)               # ragged tail handled by clamped boundary DMA

    # Weights ride in the activation dtype (bf16 feats -> bf16 MXU operands);
    # biases stay f32 and are added to the f32 accumulator.
    w1c = w1.astype(dtype)
    w2c = w2.astype(dtype)
    b1c = b1.astype(jnp.float32).reshape(H, 1)
    b2c = b2.astype(jnp.float32).reshape(Cout, 1)

    flops = 2 * B * M * (C * H + H * Cout)
    bytes_accessed = ((B * C * M + B * Cout * M) * itemsize
                      + (H * C + Cout * H) * itemsize + (H + Cout) * 4)

    out = pl.pallas_call(
        _subpointconv_kernel,
        out_shape=jax.ShapeDtypeStruct((B, Cout, M), dtype),
        grid_spec=pltpu.PrefetchScalarGridSpec(
            num_scalar_prefetch=0,
            grid=(B, num_mt),
            in_specs=[
                pl.BlockSpec((None, C, tile_m), lambda b, mt: (b, 0, mt)),
                pl.BlockSpec((H, C), lambda b, mt: (0, 0)),
                pl.BlockSpec((H, 1), lambda b, mt: (0, 0)),
                pl.BlockSpec((Cout, H), lambda b, mt: (0, 0)),
                pl.BlockSpec((Cout, 1), lambda b, mt: (0, 0)),
            ],
            out_specs=pl.BlockSpec((None, Cout, tile_m), lambda b, mt: (b, 0, mt)),
        ),
        compiler_params=pltpu.CompilerParams(
            dimension_semantics=("parallel", "parallel"),
            vmem_limit_bytes=vmem_limit,
        ),
        cost_estimate=pl.CostEstimate(
            flops=flops, transcendentals=0, bytes_accessed=bytes_accessed),
    )(x, w1c, b1c, w2c, b2c)

    # (B, Cout, G*N) -> (B, Cout, G, N) is free; final transpose matches PyTorch
    # output layout (B, Cout, N, G).  Consumers accepting (B, Cout, G, N) can skip it.
    out = out.reshape(B, Cout, G, N)
    return jnp.transpose(out, (0, 1, 3, 2))


class SubPointConvPallas:
    """JAX/Pallas re-implementation of SubPointConv."""

    def __init__(self, hidden_dim, in_fdim, out_fdim, group_num, key):
        self.hidden_dim = hidden_dim
        self.group_num = group_num
        self.group_in_fdim = in_fdim // group_num
        self.group_out_fdim = out_fdim // group_num

        k1, k2, k3, k4 = jax.random.split(key, 4)
        cin, h, cout = self.group_in_fdim, hidden_dim, self.group_out_fdim

        # PyTorch Conv2d default init: uniform +- 1/sqrt(fan_in).  Stored (out, in)
        # so the kernel computes W @ x directly.
        lim1 = 1.0 / np.sqrt(cin)
        lim2 = 1.0 / np.sqrt(h)
        self.w1 = jax.random.uniform(k1, (h, cin), jnp.float32, -lim1, lim1)
        self.b1 = jax.random.uniform(k2, (h,), jnp.float32, -lim1, lim1)
        self.w2 = jax.random.uniform(k3, (cout, h), jnp.float32, -lim2, lim2)
        self.b2 = jax.random.uniform(k4, (cout,), jnp.float32, -lim2, lim2)

    def __call__(self, feats, compute_dtype=None):
        return sub_point_conv(feats, self.w1, self.b1, self.w2, self.b2,
                              self.group_num, compute_dtype=compute_dtype)


def _reference(feats, w1, b1, w2, b2, group_num):
    B, CG, N = feats.shape
    C = CG // group_num
    x = feats.reshape(B, C, group_num, N)                                  # (B,C,G,N)
    h = jnp.einsum('hc,bcgn->bhgn', w1, x, precision='highest')
    h = jnp.maximum(h + b1[None, :, None, None], 0.0)
    y = jnp.einsum('oh,bhgn->bogn', w2, h, precision='highest')
    y = y + b2[None, :, None, None]                                        # (B,Cout,G,N)
    return jnp.transpose(y, (0, 1, 3, 2))                                  # (B,Cout,N,G)


if __name__ == "__main__":
    key = jax.random.PRNGKey(0)
    k_param, k_d1, k_d2, k_d3 = jax.random.split(key, 4)

    # Small shapes consistent with the module.
    B, N = 2, 16
    in_fdim, out_fdim, group_num, hidden_dim = 8, 16, 4, 32

    module = SubPointConvPallas(hidden_dim, in_fdim, out_fdim, group_num, k_param)
    fwd = jax.jit(module.__call__)
    fwd_bf16 = jax.jit(lambda f: module(f, compute_dtype=jnp.bfloat16))

    # 1) tiny N (single full-extent block)
    feats = jax.random.normal(k_d1, (B, in_fdim, N), jnp.float32)
    out = jax.block_until_ready(fwd(feats))
    expected_shape = (B, out_fdim // group_num, N, group_num)
    assert out.shape == expected_shape, (out.shape, expected_shape)
    ref = _reference(feats, module.w1, module.b1, module.w2, module.b2, group_num)
    np.testing.assert_allclose(np.asarray(out), np.asarray(ref), rtol=1e-4, atol=1e-4)

    # 2) lane-aligned larger N (tiled fast path, fused G*N axis)
    N2 = 1024
    feats2 = jax.random.normal(k_d2, (B, in_fdim, N2), jnp.float32)
    out2 = jax.block_until_ready(fwd(feats2))
    assert out2.shape == (B, out_fdim // group_num, N2, group_num)
    ref2 = _reference(feats2, module.w1, module.b1, module.w2, module.b2, group_num)
    np.testing.assert_allclose(np.asarray(out2), np.asarray(ref2), rtol=1e-4, atol=1e-4)

    # 3) ragged N (cdiv grid, masked trailing block; no pad / slice passes)
    N3 = 1000
    feats3 = jax.random.normal(k_d3, (B, in_fdim, N3), jnp.float32)
    out3 = jax.block_until_ready(fwd(feats3))
    assert out3.shape == (B, out_fdim // group_num, N3, group_num)
    ref3 = _reference(feats3, module.w1, module.b1, module.w2, module.b2, group_num)
    np.testing.assert_allclose(np.asarray(out3), np.asarray(ref3), rtol=1e-4, atol=1e-4)

    # 4) bf16 activation path (halves HBM traffic; f32 accumulation in-kernel)
    out2_bf16 = jax.block_until_ready(fwd_bf16(feats2))
    assert out2_bf16.shape == (B, out_fdim // group_num, N2, group_num)
    np.testing.assert_allclose(np.asarray(out2_bf16).astype(np.float32),
                               np.asarray(ref2), rtol=5e-2, atol=5e-2)

    print("KERNEL_OK")
</pallas_src>

<mosaic_0001>
module attributes {stable_mosaic.version = 11 : i64} {
  func.func @_subpointconv_kernel(%arg0: i32, %arg1: i32, %arg2: memref<1x2x64xf32, #tpu.memory_space<vmem>>, %arg3: memref<32x2xf32, #tpu.memory_space<vmem>>, %arg4: memref<32x1xf32, #tpu.memory_space<vmem>>, %arg5: memref<4x32xf32, #tpu.memory_space<vmem>>, %arg6: memref<4x1xf32, #tpu.memory_space<vmem>>, %arg7: memref<1x4x64xf32, #tpu.memory_space<vmem>>) attributes {dimension_semantics = [#tpu.dimension_semantics<parallel>, #tpu.dimension_semantics<parallel>], iteration_bounds = array<i64: 2, 1>, scalar_prefetch = 0 : i64, scratch_operands = 0 : i64, tpu.core_type = #tpu.core_type<tc>, window_params = [{transform_indices = @transform_0, window_bounds = array<i64: 1, 2, 64>}, {pipeline_mode = #tpu.pipeline_mode<synchronous>, transform_indices = @transform_1, window_bounds = array<i64: 32, 2>}, {pipeline_mode = #tpu.pipeline_mode<synchronous>, transform_indices = @transform_2, window_bounds = array<i64: 32, 1>}, {pipeline_mode = #tpu.pipeline_mode<synchronous>, transform_indices = @transform_3, window_bounds = array<i64: 4, 32>}, {pipeline_mode = #tpu.pipeline_mode<synchronous>, transform_indices = @transform_4, window_bounds = array<i64: 4, 1>}, {transform_indices = @transform_5, window_bounds = array<i64: 1, 4, 64>}]} {
    %c0 = arith.constant 0 : index
    %c0_0 = arith.constant 0 : index
    %c0_1 = arith.constant 0 : index
    %0 = vector.load %arg2[%c0, %c0_0, %c0_1] : memref<1x2x64xf32, #tpu.memory_space<vmem>>, vector<1x2x64xf32>
    %1 = vector.shape_cast %0 : vector<1x2x64xf32> to vector<2x64xf32>
    %c0_2 = arith.constant 0 : index
    %c0_3 = arith.constant 0 : index
    %2 = vector.load %arg3[%c0_2, %c0_3] : memref<32x2xf32, #tpu.memory_space<vmem>>, vector<32x2xf32>
    %cst = arith.constant dense<0.000000e+00> : vector<32x64xf32>
    %3 = tpu.matmul %2, %1, %cst {dimension_numbers = #tpu.dot_dimension_numbers<[1], [0], [0], [1], [0, 0, 1, 1], [], []>} : vector<32x2xf32>, vector<2x64xf32>, vector<32x64xf32> -> vector<32x64xf32>
    %c0_4 = arith.constant 0 : index
    %c0_5 = arith.constant 0 : index
    %4 = vector.load %arg4[%c0_4, %c0_5] : memref<32x1xf32, #tpu.memory_space<vmem>>, vector<32x1xf32>
    %5 = vector.broadcast %4 : vector<32x1xf32> to vector<32x64xf32>
    %6 = arith.addf %3, %5 : vector<32x64xf32>
    %cst_6 = arith.constant 0.000000e+00 : f32
    %7 = vector.broadcast %cst_6 : f32 to vector<32x64xf32>
    %8 = arith.maximumf %6, %7 : vector<32x64xf32>
    %c0_7 = arith.constant 0 : index
    %c0_8 = arith.constant 0 : index
    %9 = vector.load %arg5[%c0_7, %c0_8] : memref<4x32xf32, #tpu.memory_space<vmem>>, vector<4x32xf32>
    %cst_9 = arith.constant dense<0.000000e+00> : vector<4x64xf32>
    %10 = tpu.matmul %9, %8, %cst_9 {dimension_numbers = #tpu.dot_dimension_numbers<[1], [0], [0], [1], [0, 0, 1, 1], [], []>} : vector<4x32xf32>, vector<32x64xf32>, vector<4x64xf32> -> vector<4x64xf32>
    %c0_10 = arith.constant 0 : index
    %c0_11 = arith.constant 0 : index
    %11 = vector.load %arg6[%c0_10, %c0_11] : memref<4x1xf32, #tpu.memory_space<vmem>>, vector<4x1xf32>
    %12 = vector.broadcast %11 : vector<4x1xf32> to vector<4x64xf32>
    %13 = arith.addf %10, %12 : vector<4x64xf32>
    %c0_12 = arith.constant 0 : index
    %c0_13 = arith.constant 0 : index
    %c0_14 = arith.constant 0 : index
    %14 = vector.load %arg7[%c0_12, %c0_13, %c0_14] : memref<1x4x64xf32, #tpu.memory_space<vmem>>, vector<1x4x64xf32>
    %15 = vector.shape_cast %14 : vector<1x4x64xf32> to vector<4x64xf32>
    %16 = vector.shape_cast %13 : vector<4x64xf32> to vector<1x4x64xf32>
    tpu.vector_store %arg7[%c0_12, %c0_13, %c0_14], %16 {strides = array<i32>} : memref<1x4x64xf32, #tpu.memory_space<vmem>>, vector<1x4x64xf32>,
    return
  }
  func.func @transform_0(%arg0: i32, %arg1: i32) -> (i32, i32, i32) {
    %c0_i32 = arith.constant 0 : i32
    %c0_i32_0 = arith.constant 0 : i32
    return %arg0, %c0_i32, %arg1 : i32, i32, i32
  }
  func.func @transform_1(%arg0: i32, %arg1: i32) -> (i32, i32) {
    %c0_i32 = arith.constant 0 : i32
    %c0_i32_0 = arith.constant 0 : i32
    %c0_i32_1 = arith.constant 0 : i32
    return %c0_i32, %c0_i32_0 : i32, i32
  }
  func.func @transform_2(%arg0: i32, %arg1: i32) -> (i32, i32) {
    %c0_i32 = arith.constant 0 : i32
    %c0_i32_0 = arith.constant 0 : i32
    %c0_i32_1 = arith.constant 0 : i32
    return %c0_i32, %c0_i32_0 : i32, i32
  }
  func.func @transform_3(%arg0: i32, %arg1: i32) -> (i32, i32) {
    %c0_i32 = arith.constant 0 : i32
    %c0_i32_0 = arith.constant 0 : i32
    %c0_i32_1 = arith.constant 0 : i32
    return %c0_i32, %c0_i32_0 : i32, i32
  }
  func.func @transform_4(%arg0: i32, %arg1: i32) -> (i32, i32) {
    %c0_i32 = arith.constant 0 : i32
    %c0_i32_0 = arith.constant 0 : i32
    %c0_i32_1 = arith.constant 0 : i32
    return %c0_i32, %c0_i32_0 : i32, i32
  }
  func.func @transform_5(%arg0: i32, %arg1: i32) -> (i32, i32, i32) {
    %c0_i32 = arith.constant 0 : i32
    %c0_i32_0 = arith.constant 0 : i32
    return %arg0, %c0_i32, %arg1 : i32, i32, i32
  }
}

</mosaic_0001>

<bundles_post_ra>
// kernel: a_call__.1
= control target key start
LH: loop header
LB: loop body
LE: loop exit
PB: predicated region body
PF: predicated region fallthrough
CT: control target
= control target key end

     0   :  { %10 = vsyncpa [#allocation3], 0  ;;  %s773_s0 = inlined_call_operand.vmem [shape: f32[2,2,64], index: 0, kind: input, shape index: {}]   ;;  %s774_s1 = inlined_call_operand.hbm [shape: f32[32,2], index: 1, kind: input, shape index: {}]   ;;  %s775_s2 = inlined_call_operand.hbm [shape: f32[32,1], index: 2, kind: input, shape index: {}]   ;;  %s776_s3 = inlined_call_operand.vmem [shape: f32[4,32], index: 3, kind: input, shape index: {}]   ;;  %s777_s4 = inlined_call_operand.vmem [shape: f32[4,1], index: 4, kind: input, shape index: {}]   ;;  %s778_s5 = inlined_call_operand.vmem [shape: f32[2,4,64], index: 5, kind: output, shape index: {}]  }
   0x1   :  { %11 = vsyncpa [#allocation5], 0  ;;  %s693_s18 = smov 0   ;;  %s695_s19 = smov 0  }
   0x2   :  { %s697_s20 = smov 0  }
   0x3 LB: > { %s494_s21 = sadd.s32 4294967295, %s656_s20   ;;  %s29_s22 = sadd.s32 1, %s652_s19  ;;  %s656_s20 = sphi %s697_s20, %s17_s20   ;;  %s652_s19 = sphi %s695_s19, %s782_s19   ;;  %s648_s18 = sphi %s693_s18, %s781_s18  }
   0x4   : > { %p31_p0 = scmp.ge.s32.totalorder %s29_s22, 2  ;;  %p496_p1 = scmp.ge.s32.totalorder %s656_s20, 1 }
   0x5   : > { %p174_p2 = scmp.lt.s32.totalorder %s656_s20, 3  ;;  %p718_p4 = scmp.eq.s32.totalorder %s494_s21, 0 }
   0x6   : > { %s784_s22 = smov (%p31_p0, %s29_s22), 0  ;;  %s185_s27 = sshll.u32 %s774_s1, 4  ;;  %s186_s27 = int_to_ptr.hbm [resolvable:$true] %s185_s27 }
   0x7   : > { %p714_p3 = pnand %p496_p1, %p174_p2  ;;  %s658_s28 = smov [#allocation2]  }
   0x8   : > { %s187_s29 = sshll.u32 %s658_s28, 4  ;;  %s199_s7 = sshll.u32 %s775_s2, 4  ;;  %s188_s29 = int_to_ptr.vmem [resolvable:$true] %s187_s29  ;;  %s200_s7 = int_to_ptr.hbm [resolvable:$true] %s199_s7 }
   0x9   : > { %p523_p5 = pneg %p714_p3  ;;  %s659_s8 = smov 128  }
   0xa   : > { %s660_s9 = smov 8   ;;  %s661_s10 = smov [#allocation4]  }
   0xb   : > { %p524_p6 = pnand %p718_p4, %p523_p5  ;;  %s201_s11 = sshll.u32 %s661_s10, 4  ;;  %s202_s11 = int_to_ptr.vmem [resolvable:$true] %s201_s11 }
   0xc   : > { %233 = sbr.rel (%p714_p3) target bundleno = 305 (0x131), region = 40 }
   0xd   : > { %526 = dma.hbm_to_vmem [thread:$0]  (!%p524_p6), %s186_s27, 512, %s188_s29, [#allocation3], %s659_s8, %s659_s8, %s660_s9  }
   0xe   : > { %529 = dma.hbm_to_vmem [thread:$0]  (!%p524_p6), %s200_s7, 512, %s202_s11, [#allocation5], %s659_s8, %s659_s8, %s660_s9  }
  0x11   : > { %639 = dma.done.wait (%p718_p4), [#allocation3], 512  }
  0x12   : > { %641 = vsyncadd (%p718_p4), [#allocation3], 4294966784 }
  0x13   : > { %643 = dma.done.wait (%p718_p4), [#allocation5], 512  }
  0x14   : > { %645 = vsyncadd (%p718_p4), [#allocation5], 4294966784  ;;  %p271_p7 = scmp.lt.s32.totalorder %s648_s18, 1  ;;  %v662_v0 = vmov 0   ;;  %vm327_vm0 = vcmask 1041408   ;;  %vm314_vm1 = vcmask 15360  }
  0x15   : > { %563 = vset.pattern.permute.xlu0 %v662_v0  ;;  %564 = vset.pattern.permute.xlu1 %v662_v0  ;;  %v287_v2 = vld [vmem:[#allocation2 + $0x8] sm:$0xff]  ;;  %v289_v3 = vld [vmem:[#allocation2 + $0x18] sm:$0xff]  ;;  %v286_v5 = vld [vmem:[#allocation2] sm:$0xff]  ;;  %vm371_vm2 = vcmask 261120   ;;  %vm395_vm3 = vcmask 519168  }
  0x16   : > { %s786_s18 = smov (!%p271_p7, %s648_s18), 1  ;;  %565 = vset.pattern.permute.xlu2 %v662_v0  ;;  %v293_v4 = vld [vmem:[#allocation4 + $0x18] sm:$0xff]  ;;  %v291_v6 = vld [vmem:[#allocation4 + $0x8] sm:$0xff]  ;;  %v288_v7 = vld [vmem:[#allocation2 + $0x10] sm:$0xff] }
  0x17   : > { %s503_s12 = sshll.u32 %s786_s18, 1  ;;  %311 = vperm.xlu0 %563, %v293_v4   ;;  %301 = vperm.xlu1 %564, %v291_v6   ;;  %v292_v8 = vld [vmem:[#allocation4 + $0x10] sm:$0xff]  ;;  %v290_v9 = vld [vmem:[#allocation4] sm:$0xff]  ;;  %s504_s24 = sshll.u32 %s786_s18, 2 }
  0x18   : > { %s277_s15 = scalar_lea.vmem %s773_s0, %s503_s12  ;;  %v365_v10 = vld [vmem:[%s777_s4] sm:$0xf]  ;;  %s284_s27 = scalar_lea.vmem %s778_s5, %s504_s24 }
  0x19   : > { %v285_v1 = vld [vmem:[%s277_s15] sm:$0x3]  ;;  %368 = vperm.xlu2 %565, %v365_v10  }
  0x1a   : > { %513 = vmatpush.msk.msra.mxu2 %vm327_vm0, %v285_v1  ;;  %514 = vmatpush.msk.msra.mxu3 %vm327_vm0, %v285_v1  ;;  %v364_v27 = vld [vmem:[%s776_s3] sm:$0xf] }
  0x1b   : > { %507 = vmatmul.msk.f32.vlgmr.msra.gmra.mxu2 %vm314_vm1, %v287_v2  ;;  %509 = vmatmul.msk.f32.vlgmr.msra.gmra.mxu3 %vm314_vm1, %v289_v3 }
  0x1c   : > { %505 = vmatpush.msk.msra.mxu0 %vm327_vm0, %v285_v1 }
  0x1d   : > { %506 = vmatmul.msk.f32.vlgmr.msra.gmra.mxu0 %vm314_vm1, %v286_v5 }
  0x1f   : > { %306 = vperm.xlu0 %563, %v292_v8   ;;  %296 = vperm.xlu1 %564, %v290_v9  }
  0x23   : > { %508 = vmatmul.msk.f32.gmra.mxu2 %vm314_vm1, %v288_v7 }
  0x73   : > { %v369_v28 = vpop.permute.xlu2 %368 }
  0x89   : > { %v312_v11 = vpop.permute.xlu0 %311  ;;  %v302_v12 = vpop.permute.xlu1 %301 }
  0x91   : > { %v307_v17 = vpop.permute.xlu0 %306  ;;  %v297_v18 = vpop.permute.xlu1 %296 }
  0x9a   : > { %v348_v19 = vpop.f32.mrf.mxu0 }
  0x9b   : > { %v349_v23 = vadd.f32 %v348_v19, %v297_v18 }
  0x9d   : > { %v360_v26 = vmax.f32 %v349_v23, 0.0 }
  0x9e   : > { %v351_v13 = vpop.f32.mrf.mxu2  ;;  %v357_v14 = vpop.f32.mrf.mxu3 }
  0x9f   : > { %v358_v15 = vadd.f32 %v357_v14, %v312_v11  ;;  %v352_v21 = vadd.f32 %v351_v13, %v302_v12 }
  0xa1   : > { %v363_v16 = vmax.f32 %v358_v15, 0.0  ;;  %v361_v25 = vmax.f32 %v352_v21, 0.0 }
  0xa3   : > { %387 = vmatpush.msra.mxu1 %v363_v16 }
  0xa6   : > { %v354_v20 = vpop.f32.mrf.mxu2 }
  0xa7   : > { %v355_v22 = vadd.f32 %v354_v20, %v307_v17 }
  0xa9   : > { %v362_v24 = vmax.f32 %v355_v22, 0.0 }
  0xab   : > { %388 = vmatpush.msra.mxu1 %v362_v24 }
  0xad   : > { %389 = vmatpush.msra.mxu1 %v361_v25 }
  0xaf   : > { %390 = vmatpush.msra.mxu1 %v360_v26 }
  0xb0   : > { %510 = vmatmul.msk.f32.vlgmr.msra.gmra.mxu1 %vm371_vm2, %v364_v27 }
 0x12d   : > { %v392_v29 = vpop.f32.mrf.mxu1 }
 0x12e   : > { %v393_v30 = vadd.f32 %v392_v29, %v369_v28 }
 0x130   : > { %396 = vst.msk [vmem:[%s284_s27] sm:$0xf] %vm395_vm3, %v393_v30 }
 0x131 PF: > { %s17_s20 = sadd.s32 1, %s656_s20   ;;  %s781_s18 = smov %s652_s19 }
 0x132   : > { %p14_p8 = scmp.ge.s32.totalorder %s17_s20, 4   ;;  %s782_s19 = smov %s784_s22 }
 0x134   :  { %16 = sbr.rel (!%p14_p8) target bundleno = 3 (0x3), region = 79 }
 0x139   :  { %422 = vsyncpa [#allocation3], 1 }
 0x13a   :  { %424 = vsyncpa [#allocation3 + $0x1], 1 }
 0x13b   :  { %425 = vsyncpa [#allocation5], 1 }

</bundles_post_ra>
